<compile_context>
chip_gen: v7x
topology: tpu7x:2x2x1
jax: 0.10.0
libtpu: 0.0.40
codegen_flags: <defaults>
</compile_context>

<pallas_src>
import jax
import jax.numpy as jnp
from jax.experimental import pallas as pl
from jax.experimental.pallas import tpu as pltpu


def cbam_kernel(x_ref, w1_ref, b1_ref, w2_ref, b2_ref, o_ref):
    # x block: (Bt, C, HW)
    x = x_ref[...].astype(jnp.float32)
    bt, c, hw = x.shape

    # Pooled stats for the whole block at once (lane reductions over HW).
    # TODO(synk): if HW is ever not a multiple of 128 with a tiled HW axis,
    # mask the padded lanes (-inf for max) before reducing.
    avg = jnp.sum(x, axis=-1) * (1.0 / hw)          # (Bt, C)
    mx = jnp.max(x, axis=-1)                        # (Bt, C)
    pooled = jnp.concatenate([avg, mx], axis=0)     # (2*Bt, C)

    w1 = w1_ref[...]                                # (Ch, C)
    b1 = b1_ref[...]                                # (1, Ch)
    w2 = w2_ref[...]                                # (C, Ch)
    b2 = b2_ref[...]                                # (1, C)

    # Shared MLP, fused over both pools and all Bt samples, on VPU + XLU
    # (broadcast-multiply + lane reduce) instead of tiny MXU matmuls.
    # h = pooled @ w1.T + b1
    h = jnp.sum(pooled[:, None, :] * w1[None, :, :], axis=-1) + b1   # (2*Bt, Ch)
    h = jnp.maximum(h, 0.0)                                          # ReLU
    # out = h @ w2.T + b2
    out = jnp.sum(h[:, None, :] * w2[None, :, :], axis=-1) + b2      # (2*Bt, C)

    gate = jax.nn.sigmoid(out[:bt] + out[bt:])                       # (Bt, C)

    # Broadcast the per-(batch, channel) gate across the spatial lanes.
    o_ref[...] = (x * gate[:, :, None]).astype(o_ref.dtype)


def cbam_forward(x, w1, b1, w2, b2, *, target_block_bytes=4 << 20):
    """x: (B, C, H, W).  Returns (B, C, H, W)."""
    B, C, H, W = x.shape
    HW = H * W
    Ch = w1.shape[0]

    x_flat = x.reshape(B, C, HW)
    b1_2d = b1.reshape(1, Ch)
    b2_2d = b2.reshape(1, C)

    # Pick a batch-block size: big tiles (amortize ~0.35us/step grid overhead,
    # hit HBM roofline) but keep >=2 grid steps when B >= 2 so both v7x
    # TensorCores get work, and stay well under the scoped VMEM limit
    # (2 bufs x (in + out) x tile <= ~16-32 MiB).
    per_batch_bytes = C * HW * x.dtype.itemsize
    bt_cap = max(1, target_block_bytes // per_batch_bytes)
    min_steps = 2 if B >= 2 else 1
    bt = max(1, min(int(bt_cap), B // min_steps))
    while B % bt != 0:          # keep Bt an exact divisor of B
        bt -= 1
    num_steps = B // bt

    out_flat = pl.pallas_call(
        cbam_kernel,
        out_shape=jax.ShapeDtypeStruct((B, C, HW), x.dtype),
        grid_spec=pltpu.PrefetchScalarGridSpec(
            num_scalar_prefetch=0,
            grid=(num_steps,),
            in_specs=[
                pl.BlockSpec((bt, C, HW), lambda i: (i, 0, 0)),  # x block
                pl.BlockSpec((Ch, C), lambda i: (0, 0)),         # W1 (full)
                pl.BlockSpec((1, Ch), lambda i: (0, 0)),         # b1 (full)
                pl.BlockSpec((C, Ch), lambda i: (0, 0)),         # W2 (full)
                pl.BlockSpec((1, C), lambda i: (0, 0)),          # b2 (full)
            ],
            out_specs=pl.BlockSpec((bt, C, HW), lambda i: (i, 0, 0)),
        ),
        compiler_params=pltpu.CompilerParams(
            dimension_semantics=("parallel",)),
    )(x_flat, w1, b1_2d, w2, b2_2d)

    return out_flat.reshape(B, C, H, W)


def cbam_reference(x, w1, b1, w2, b2):
    """Pure-JAX reference matching the PyTorch forward."""
    avg = jnp.mean(x, axis=(2, 3))                         # (B, C)
    mx = jnp.max(x, axis=(2, 3))                           # (B, C)

    def fc(p):
        h = jnp.maximum(p @ w1.T + b1, 0.0)
        return h @ w2.T + b2

    gate = jax.nn.sigmoid(fc(avg) + fc(mx))                # (B, C)
    return x * gate[:, :, None, None]


if __name__ == "__main__":
    key = jax.random.PRNGKey(0)
    B, C, H, W = 2, 32, 16, 16
    reduction = 16
    Ch = C // reduction  # hidden = 2

    kx, k1, k2, k3, k4 = jax.random.split(key, 5)
    x = jax.random.normal(kx, (B, C, H, W), dtype=jnp.float32)

    # Deterministic synthetic parameters (PyTorch nn.Linear shapes).
    w1 = jax.random.normal(k1, (Ch, C), dtype=jnp.float32) * 0.1   # Linear(C -> C//r).weight
    b1 = jax.random.normal(k2, (Ch,), dtype=jnp.float32) * 0.1     # Linear(C -> C//r).bias
    w2 = jax.random.normal(k3, (C, Ch), dtype=jnp.float32) * 0.1   # Linear(C//r -> C).weight
    b2 = jax.random.normal(k4, (C,), dtype=jnp.float32) * 0.1      # Linear(C//r -> C).bias

    out = cbam_forward(x, w1, b1, w2, b2)
    out = jax.block_until_ready(out)

    ref = cbam_reference(x, w1, b1, w2, b2)
    assert out.shape == ref.shape == (B, C, H, W)
    assert jnp.allclose(out, ref, rtol=1e-5, atol=1e-5), "mismatch vs reference"

    print("KERNEL_OK")
</pallas_src>

<mosaic_0001>
module attributes {stable_mosaic.version = 11 : i64} {
  func.func @cbam_kernel(%arg0: i32, %arg1: memref<1x32x256xf32, #tpu.memory_space<vmem>>, %arg2: memref<2x32xf32, #tpu.memory_space<vmem>>, %arg3: memref<1x2xf32, #tpu.memory_space<vmem>>, %arg4: memref<32x2xf32, #tpu.memory_space<vmem>>, %arg5: memref<1x32xf32, #tpu.memory_space<vmem>>, %arg6: memref<1x32x256xf32, #tpu.memory_space<vmem>>) attributes {dimension_semantics = [#tpu.dimension_semantics<parallel>], iteration_bounds = array<i64: 2>, scalar_prefetch = 0 : i64, scratch_operands = 0 : i64, tpu.core_type = #tpu.core_type<tc>, window_params = [{transform_indices = @transform_0, window_bounds = array<i64: 1, 32, 256>}, {pipeline_mode = #tpu.pipeline_mode<synchronous>, transform_indices = @transform_1, window_bounds = array<i64: 2, 32>}, {pipeline_mode = #tpu.pipeline_mode<synchronous>, transform_indices = @transform_2, window_bounds = array<i64: 1, 2>}, {pipeline_mode = #tpu.pipeline_mode<synchronous>, transform_indices = @transform_3, window_bounds = array<i64: 32, 2>}, {pipeline_mode = #tpu.pipeline_mode<synchronous>, transform_indices = @transform_4, window_bounds = array<i64: 1, 32>}, {transform_indices = @transform_5, window_bounds = array<i64: 1, 32, 256>}]} {
    %c0 = arith.constant 0 : index
    %c0_0 = arith.constant 0 : index
    %c0_1 = arith.constant 0 : index
    %0 = vector.load %arg1[%c0, %c0_0, %c0_1] : memref<1x32x256xf32, #tpu.memory_space<vmem>>, vector<1x32x256xf32>
    %cst = arith.constant dense<0.000000e+00> : vector<1x32xf32>
    %1 = vector.multi_reduction <add>, %0, %cst [2] : vector<1x32x256xf32> to vector<1x32xf32>
    %cst_2 = arith.constant 3.906250e-03 : f32
    %2 = vector.broadcast %cst_2 : f32 to vector<1x32xf32>
    %3 = arith.mulf %1, %2 : vector<1x32xf32>
    %cst_3 = arith.constant dense<0xFF800000> : vector<1x32xf32>
    %4 = vector.multi_reduction <maximumf>, %0, %cst_3 [2] : vector<1x32x256xf32> to vector<1x32xf32>
    %5 = tpu.concatenate %3, %4 in 0 : vector<1x32xf32>, vector<1x32xf32> -> vector<2x32xf32>
    %c0_4 = arith.constant 0 : index
    %c0_5 = arith.constant 0 : index
    %6 = vector.load %arg2[%c0_4, %c0_5] : memref<2x32xf32, #tpu.memory_space<vmem>>, vector<2x32xf32>
    %c0_6 = arith.constant 0 : index
    %c0_7 = arith.constant 0 : index
    %7 = vector.load %arg3[%c0_6, %c0_7] : memref<1x2xf32, #tpu.memory_space<vmem>>, vector<1x2xf32>
    %c0_8 = arith.constant 0 : index
    %c0_9 = arith.constant 0 : index
    %8 = vector.load %arg4[%c0_8, %c0_9] : memref<32x2xf32, #tpu.memory_space<vmem>>, vector<32x2xf32>
    %c0_10 = arith.constant 0 : index
    %c0_11 = arith.constant 0 : index
    %9 = vector.load %arg5[%c0_10, %c0_11] : memref<1x32xf32, #tpu.memory_space<vmem>>, vector<1x32xf32>
    %10 = vector.shape_cast %5 : vector<2x32xf32> to vector<2x1x32xf32>
    %11 = vector.shape_cast %6 : vector<2x32xf32> to vector<1x2x32xf32>
    %12 = vector.broadcast %10 : vector<2x1x32xf32> to vector<2x2x32xf32>
    %13 = vector.broadcast %11 : vector<1x2x32xf32> to vector<2x2x32xf32>
    %14 = arith.mulf %12, %13 : vector<2x2x32xf32>
    %cst_12 = arith.constant dense<0.000000e+00> : vector<2x2xf32>
    %15 = vector.multi_reduction <add>, %14, %cst_12 [2] : vector<2x2x32xf32> to vector<2x2xf32>
    %16 = vector.broadcast %7 : vector<1x2xf32> to vector<2x2xf32>
    %17 = arith.addf %15, %16 : vector<2x2xf32>
    %cst_13 = arith.constant 0.000000e+00 : f32
    %18 = vector.broadcast %cst_13 : f32 to vector<2x2xf32>
    %19 = arith.maximumf %17, %18 : vector<2x2xf32>
    %20 = vector.shape_cast %19 : vector<2x2xf32> to vector<2x1x2xf32>
    %21 = vector.shape_cast %8 : vector<32x2xf32> to vector<1x32x2xf32>
    %22 = vector.broadcast %20 : vector<2x1x2xf32> to vector<2x32x2xf32>
    %23 = vector.broadcast %21 : vector<1x32x2xf32> to vector<2x32x2xf32>
    %24 = arith.mulf %22, %23 : vector<2x32x2xf32>
    %cst_14 = arith.constant dense<0.000000e+00> : vector<2x32xf32>
    %25 = vector.multi_reduction <add>, %24, %cst_14 [2] : vector<2x32x2xf32> to vector<2x32xf32>
    %26 = vector.broadcast %9 : vector<1x32xf32> to vector<2x32xf32>
    %27 = arith.addf %25, %26 : vector<2x32xf32>
    %28 = vector.extract_strided_slice %27 {offsets = [0, 0], sizes = [1, 32], strides = [1, 1]} : vector<2x32xf32> to vector<1x32xf32>
    %29 = vector.extract_strided_slice %27 {offsets = [1, 0], sizes = [1, 32], strides = [1, 1]} : vector<2x32xf32> to vector<1x32xf32>
    %30 = arith.addf %28, %29 : vector<1x32xf32>
    %31 = arith.negf %30 : vector<1x32xf32>
    %32 = math.exp %31 : vector<1x32xf32>
    %cst_15 = arith.constant 1.000000e+00 : f32
    %33 = vector.broadcast %cst_15 : f32 to vector<1x32xf32>
    %34 = arith.addf %33, %32 : vector<1x32xf32>
    %35 = arith.divf %33, %34 : vector<1x32xf32>
    %36 = vector.shape_cast %35 : vector<1x32xf32> to vector<1x32x1xf32>
    %37 = vector.broadcast %36 : vector<1x32x1xf32> to vector<1x32x256xf32>
    %38 = arith.mulf %0, %37 : vector<1x32x256xf32>
    %c0_16 = arith.constant 0 : index
    %c0_17 = arith.constant 0 : index
    %c0_18 = arith.constant 0 : index
    %39 = vector.load %arg6[%c0_16, %c0_17, %c0_18] : memref<1x32x256xf32, #tpu.memory_space<vmem>>, vector<1x32x256xf32>
    tpu.vector_store %arg6[%c0_16, %c0_17, %c0_18], %38 {strides = array<i32>} : memref<1x32x256xf32, #tpu.memory_space<vmem>>, vector<1x32x256xf32>,
    return
  }
  func.func @transform_0(%arg0: i32) -> (i32, i32, i32) {
    %c0_i32 = arith.constant 0 : i32
    %c0_i32_0 = arith.constant 0 : i32
    %c0_i32_1 = arith.constant 0 : i32
    return %arg0, %c0_i32, %c0_i32_0 : i32, i32, i32
  }
  func.func @transform_1(%arg0: i32) -> (i32, i32) {
    %c0_i32 = arith.constant 0 : i32
    %c0_i32_0 = arith.constant 0 : i32
    %c0_i32_1 = arith.constant 0 : i32
    return %c0_i32, %c0_i32_0 : i32, i32
  }
  func.func @transform_2(%arg0: i32) -> (i32, i32) {
    %c0_i32 = arith.constant 0 : i32
    %c0_i32_0 = arith.constant 0 : i32
    %c0_i32_1 = arith.constant 0 : i32
    return %c0_i32, %c0_i32_0 : i32, i32
  }
  func.func @transform_3(%arg0: i32) -> (i32, i32) {
    %c0_i32 = arith.constant 0 : i32
    %c0_i32_0 = arith.constant 0 : i32
    %c0_i32_1 = arith.constant 0 : i32
    return %c0_i32, %c0_i32_0 : i32, i32
  }
  func.func @transform_4(%arg0: i32) -> (i32, i32) {
    %c0_i32 = arith.constant 0 : i32
    %c0_i32_0 = arith.constant 0 : i32
    %c0_i32_1 = arith.constant 0 : i32
    return %c0_i32, %c0_i32_0 : i32, i32
  }
  func.func @transform_5(%arg0: i32) -> (i32, i32, i32) {
    %c0_i32 = arith.constant 0 : i32
    %c0_i32_0 = arith.constant 0 : i32
    %c0_i32_1 = arith.constant 0 : i32
    return %arg0, %c0_i32, %c0_i32_0 : i32, i32, i32
  }
}

</mosaic_0001>

<bundles_post_ra>
// kernel: tpu_custom_call.1
= control target key start
LH: loop header
LB: loop body
LE: loop exit
PB: predicated region body
PF: predicated region fallthrough
CT: control target
= control target key end

     0   :  { %10 = vsyncpa [#allocation3], 0  ;;  %s2345_s0 = inlined_call_operand.hbm [shape: f32[2,32,256], index: 0, kind: input, shape index: {}]   ;;  %s2346_s1 = inlined_call_operand.vmem [shape: f32[2,32], index: 1, kind: input, shape index: {}]   ;;  %s2347_s2 = inlined_call_operand.vmem [shape: f32[1,2], index: 2, kind: input, shape index: {}]   ;;  %s2348_s3 = inlined_call_operand.vmem [shape: f32[32,2], index: 3, kind: input, shape index: {}]   ;;  %s2349_s4 = inlined_call_operand.vmem [shape: f32[1,32], index: 4, kind: input, shape index: {}]   ;;  %s2350_s5 = inlined_call_operand.hbm [shape: f32[2,32,256], index: 5, kind: output, shape index: {}]  }
   0x1   :  { %12 = vsyncpa [#allocation3 + $0x1], 0 }
   0x2   :  { %13 = vsyncpa [#allocation4], 0 }
   0x3   :  { %15 = vsyncpa [#allocation4 + $0x1], 0  ;;  %s1750_s18 = smov 0   ;;  %s1752_s19 = smov 0  }
   0x4   :  { %s1754_s20 = smov 0   ;;  %s1756_s21 = smov 0  }
   0x5 LB: > { %s1771_s22 = sadd.s32 4294967295, %s1710_s21   ;;  %s1514_s23 = sadd.s32 4294967294, %s1710_s21   ;;  %s1710_s21 = sphi %s1756_s21, %s2363_s21   ;;  %s1706_s20 = sphi %s1754_s20, %s2362_s20   ;;  %s1702_s19 = sphi %s1752_s19, %s2361_s19   ;;  %s1698_s18 = sphi %s1750_s18, %s2360_s18  }
   0x6   : > { %s1775_s24 = sadd.s32 1, %s1710_s21   ;;  %s28_s25 = sadd.s32 1, %s1706_s20 }
   0x7   : > { %s25_s26 = ssub.s32 %s1710_s21, %s1775_s24  ;;  %p35_p0 = scmp.ne.s32.totalorder %s1706_s20, %s1702_s19 }
   0x8   : > { %p26_p1 = scmp.eq.s32.totalorder %s25_s26, 0  ;;  %p36_p2 = scmp.eq.s32.totalorder %s1710_s21, 0 }
   0x9   : > { %p41_p3 = scmp.ne.s32.totalorder %s1702_s19, %s1698_s18  ;;  %p42_p4 = scmp.eq.s32.totalorder %s1771_s22, 0 }
   0xa   : > { %s1787_s27 = scalar_select %p26_p1, %s1706_s20, %s28_s25  }
   0xb   : > { %p1789_p5 = por %p36_p2, %p35_p0  ;;  %p1793_p6 = por %p42_p4, %p41_p3 }
   0xc   : > { %p149_p7 = scmp.eq.s32.totalorder %s1771_s22, 1  ;;  %p155_p8 = scmp.eq.s32.totalorder %s1514_s23, 1 }
   0xd   : > { %p1548_p10 = scmp.lt.s32.totalorder %s1710_s21, 2  ;;  %s187_s7 = sand.u32 1, %s1706_s20  }
   0xe   : > { %p1800_p11 = por %p149_p7, %p35_p0  ;;  %p1804_p12 = por %p155_p8, %p41_p3 }
   0xf   : > { %s1534_s8 = sshll.u32 %s1710_s21, 10  ;;  %s1517_s9 = sshll.u32 %s187_s7, 6 }
  0x10   : > { %s2354_s30 = scalar_select %p1800_p11, 1, 0 }
  0x11   : > { %s2355_s6 = scalar_select %p1804_p12, 1, 0 }
  0x12   : > { %s1813_s12 = scalar_lea.hbm %s2345_s0, %s1534_s8  ;;  %s191_s13 = scalar_lea.vmem [#allocation2], %s1517_s9 }
  0x13   : > { %s198_s14 = sshll.u32 %s191_s13, 4  ;;  %p1817_p13 = pnand %p1548_p10, %p1789_p5  ;;  %s1821_s14 = int_to_ptr.vmem [resolvable:$true] %s198_s14 }
  0x14   : > { %s1823_s16 = scalar_lea.sflag [#allocation3], %s187_s7  ;;  %s1614_s17 = scalar_lea.hbm %s1813_s12, 1024 }
  0x15   : > { %p1615_p0 = scmp.ne.s32.totalorder %s1813_s12, %s1614_s17  ;;  %p1616_p1 = pneg %p1817_p13 }
  0x16   : > { %s1619_s26 = scalar_lea.hbm %s2345_s0, 2048  ;;  %p1620_p4 = scmp.lt.u32.totalorder %s1813_s12, %s2345_s0 }
  0x17   : > { %p1617_p2 = pnand %p1616_p1, %p1615_p0  ;;  %p1621_p5 = scmp.lt.u32.totalorder %s1619_s26, %s1614_s17 }
  0x18   : > { %p1623_p8 = scmp.lt.u32.totalorder %s1614_s17, %s1813_s12 }
  0x19   : > { %p1618_p3 = pneg %p1617_p2  ;;  %p1622_p7 = por %p1621_p5, %p1620_p4 }
  0x1b   : > { %p1624_p10 = por %p1623_p8, %p1622_p7 }
  0x1d   : > { %p1625_p9 = pnand %p1624_p10, %p1618_p3 }
  0x1f   : > { %1628 = shalt.err (!%p1625_p9)
}
  0x20   : > { %s1629_s7 = scalar_lea.vmem %s1821_s14, 1024  ;;  %s1712_s9 = smov [#allocation2]  }
  0x21   : > { %p1630_p0 = scmp.ne.s32.totalorder %s1821_s14, %s1629_s7  ;;  %s1634_s10 = sshll.u32 %s1712_s9, 4  ;;  %s1635_s10 = int_to_ptr.vmem [resolvable:$false] %s1634_s10 }
  0x22   : > { %s1636_s11 = scalar_lea.vmem %s1635_s10, 2048  ;;  %p1637_p11 = scmp.lt.s32.totalorder %s1821_s14, %s1635_s10 }
  0x23   : > { %p1632_p2 = pnand %p1630_p0, %p1616_p1  ;;  %p1638_p4 = scmp.lt.s32.totalorder %s1636_s11, %s1629_s7 }
  0x25   : > { %p1633_p12 = pneg %p1632_p2  ;;  %p1639_p5 = por %p1638_p4, %p1637_p11 }
  0x27   : > { %p1640_p7 = pnand %p1639_p5, %p1633_p12 }
  0x29   : > { %1643 = shalt.err (!%p1640_p7)
}
  0x2a   : > { %s1713_s13 = smov 256   ;;  %s1714_s17 = smov 16  }
  0x2b   : > { %1543 = dma.hbm_to_vmem [thread:$0]  (!%p1817_p13), %s1813_s12, 1024, %s1821_s14, %s1823_s16, %s1713_s13, %s1713_s13, %s1714_s17  }
  0x2c   : > { %p1520_p9 = scmp.ge.s32.totalorder %s1710_s21, 1  ;;  %p206_p1 = scmp.lt.s32.totalorder %s1710_s21, 3 }
  0x2e   : > { %p207_p3 = pnand %p1520_p9, %p206_p1 }
  0x2f   : > { %s1854_s23 = sand.u32 (!%p207_p3), 1, %s1702_s19  }
  0x30   : > { %210 = sbr.rel (%p207_p3) target bundleno = 1010 (0x3f2), region = 40  ;;  %s1521_s25 = sshll.u32 (!%p207_p3), %s1854_s23, 6 }
  0x31   : > { %s213_s26 = scalar_lea.sflag (!%p207_p3), [#allocation3], %s1854_s23  ;;  %s1860_s28 = scalar_lea.vmem (!%p207_p3), [#allocation2], %s1521_s25 }
  0x37   : > { %1689 = dma.done.wait (%p1793_p6), %s213_s26, 1024  }
  0x38   : > { %1691 = vsyncadd (%p1793_p6), %s213_s26, 4294966272  ;;  %v283_v0 = vlaneseq  ;;  %v247_v5 = vld [vmem:[%s1860_s28 + $0x20] sm:$0xff]  ;;  %v248_v6 = vld [vmem:[%s1860_s28 + $0x28] sm:$0xff]  ;;  %vm294_vm0 = vcmask 130112   ;;  %vm301_vm1 = vcmask 195712   ;;  %vm308_vm2 = vcmask 261312  }
  0x39   : > { %v243_v7 = vld [vmem:[%s1860_s28] sm:$0xff]  ;;  %v257_v8 = vadd.f32 %v248_v6, %v247_v5  ;;  %v244_v9 = vld [vmem:[%s1860_s28 + $0x8] sm:$0xff]  ;;  %v249_v10 = vld [vmem:[%s1860_s28 + $0x30] sm:$0xff]  ;;  %v273_v21 = vmax.f32 %v247_v5, %v248_v6  ;;  %vm335_vm3 = vcmask 1040384   ;;  %vm379_vm4 = vcmask 254976   ;;  %s242_s12 = scalar_lea.vmem [#allocation5], %s1521_s25 }
  0x3a   : > { %v284_v1 = vand.u32 127, %v283_v0  ;;  %v1866_v2 = vshrl.u32 %v283_v0, 7  ;;  %v250_v11 = vld [vmem:[%s1860_s28 + $0x38] sm:$0xff]  ;;  %v251_v13 = vadd.f32 %v244_v9, %v243_v7  ;;  %v245_v14 = vld [vmem:[%s1860_s28 + $0x10] sm:$0xff]  ;;  %v267_v19 = vmax.f32 %v243_v7, %v244_v9  ;;  %v339_v27 = vld [vmem:[%s2348_s3] sm:$0xff]  ;;  %s1441_s25 = sshll.u32 %s242_s12, 4  ;;  %s2294_s25 = int_to_ptr.vmem [resolvable:$true] %s1441_s25 }
  0x3b   : > { %v246_v15 = vld [vmem:[%s1860_s28 + $0x18] sm:$0xff]  ;;  %258 = vadd.xlane.f32.xlu1 %v257_v8  ;;  %v260_v16 = vadd.f32 %v250_v11, %v249_v10  ;;  %v276_v20 = vmax.f32 %v249_v10, %v250_v11  ;;  %v1523_v33 = vld [vmem:[%s2347_s2] ss:$0 sm:$0xff]  ;;  %v340_v43 = vld [vmem:[%s2348_s3 + $0x8] sm:$0xff]  ;;  %vm1235_vm5 = vcmask 1041409   ;;  %vm1237_vm6 = vcmask 1042434  }
  0x3c   : > { %v1869_v3 = vsub.s32 %v284_v1, %v1866_v2  ;;  %v296_v4 = vadd.s32 4294967280, %v284_v1  ;;  %252 = vadd.xlane.f32.xlu0 %v251_v13  ;;  %v254_v17 = vadd.f32 %v246_v15, %v245_v14  ;;  %v270_v18 = vmax.f32 %v245_v14, %v246_v15  ;;  %v341_v52 = vld [vmem:[%s2348_s3 + $0x10] sm:$0xff]  ;;  %v342_v61 = vld [vmem:[%s2348_s3 + $0x18] sm:$0xff]  ;;  %s1535_s14 = sshll.u32 %s1771_s22, 10  ;;  %s1428_s7 = scalar_lea.sflag [#allocation4], %s1854_s23 }
  0x3d   : > { %v303_v22 = vadd.s32 4294967272, %v284_v1  ;;  %v289_v23 = vadd.s32 4294967288, %v284_v1  ;;  %v1889_v26 = vsub.s32 0, %v1866_v2  ;;  %v1896_v29 = vsub.s32 1, %v1866_v2  ;;  %s2299_s8 = scalar_lea.hbm %s2350_s5, %s1535_s14  ;;  %s1644_s9 = scalar_lea.vmem %s2294_s25, 1024 }
  0x3e   : > { %v1878_v12 = vsub.s32 %v296_v4, %v1866_v2  ;;  %v419_v31 = vsub.s32 2, %v1866_v2  ;;  %v1901_v32 = vsub.s32 3, %v1866_v2  ;;  %v433_v35 = vsub.s32 4, %v1866_v2  ;;  %p1645_p6 = scmp.ne.s32.totalorder %s2294_s25, %s1644_s9  ;;  %p2357_p11 = scmp.ne.s32.totalorder %s2354_s30, 0 }
  0x3f   : > { %261 = vadd.xlane.f32.xlu1 %v260_v16  ;;  %v1883_v24 = vsub.s32 %v303_v22, %v1866_v2  ;;  %v1886_v25 = vsub.s32 %v289_v23, %v1866_v2  ;;  %v406_v28 = vrot.slane %v339_v27, %v1889_v26  ;;  %v413_v30 = vrot.slane %v339_v27, %v1896_v29  ;;  %s1717_s22 = smov [#allocation5]  }
  0x40   : > { %255 = vadd.xlane.f32.xlu0 %v254_v17  ;;  %v420_v34 = vrot.slane %v339_v27, %v419_v31  ;;  %v427_v36 = vrot.slane %v339_v27, %v1901_v32  ;;  %v440_v37 = vsub.s32 5, %v1866_v2  ;;  %v434_v38 = vrot.slane %v339_v27, %v433_v35  ;;  %p1646_p12 = pnand %p1645_p6, %p2357_p11  ;;  %s1648_s10 = sshll.u32 %s1717_s22, 4  ;;  %s1649_s10 = int_to_ptr.vmem [resolvable:$false] %s1648_s10 }
  0x41   : > { %v447_v39 = vsub.s32 6, %v1866_v2  ;;  %v454_v41 = vsub.s32 7, %v1866_v2  ;;  %v462_v45 = vrot.slane %v340_v43, %v1889_v26  ;;  %v469_v46 = vrot.slane %v340_v43, %v1896_v29  ;;  %s1650_s11 = scalar_lea.vmem %s1649_s10, 2048  ;;  %p1651_p8 = scmp.lt.s32.totalorder %s2294_s25, %s1649_s10 }
  0x42   : > { %v441_v40 = vrot.slane %v339_v27, %v440_v37  ;;  %v476_v47 = vrot.slane %v340_v43, %v419_v31  ;;  %v483_v48 = vrot.slane %v340_v43, %v1901_v32  ;;  %v490_v49 = vrot.slane %v340_v43, %v433_v35  ;;  %p1647_p13 = pneg %p1646_p12  ;;  %p1652_p10 = scmp.lt.s32.totalorder %s1650_s11, %s1644_s9 }
  0x43   : > { %271 = vmax.xlane.f32.xlu1 %v270_v18  ;;  %v448_v42 = vrot.slane %v339_v27, %v447_v39  ;;  %v455_v44 = vrot.slane %v339_v27, %v454_v41  ;;  %v497_v50 = vrot.slane %v340_v43, %v440_v37  ;;  %v504_v51 = vrot.slane %v340_v43, %v447_v39 }
  0x44   : > { %268 = vmax.xlane.f32.xlu0 %v267_v19  ;;  %v511_v53 = vrot.slane %v340_v43, %v454_v41  ;;  %v518_v54 = vrot.slane %v341_v52, %v1889_v26  ;;  %v525_v55 = vrot.slane %v341_v52, %v1896_v29  ;;  %v532_v56 = vrot.slane %v341_v52, %v419_v31  ;;  %p1653_p0 = por %p1652_p10, %p1651_p8 }
  0x45   : > { %v539_v57 = vrot.slane %v341_v52, %v1901_v32  ;;  %v546_v58 = vrot.slane %v341_v52, %v433_v35  ;;  %v553_v59 = vrot.slane %v341_v52, %v440_v37  ;;  %v560_v60 = vrot.slane %v341_v52, %v447_v39 }
  0x46   : > { %v567_v62 = vrot.slane %v341_v52, %v454_v41  ;;  %v574_v63 = vrot.slane %v342_v61, %v1889_v26  ;;  %v581_v0 = vrot.slane %v342_v61, %v1896_v29  ;;  %v588_v1 = vrot.slane %v342_v61, %v419_v31  ;;  %p1654_p2 = pnand %p1653_p0, %p1647_p13 }
  0x47   : > { %277 = vmax.xlane.f32.xlu1 %v276_v20  ;;  %v595_v4 = vrot.slane %v342_v61, %v1901_v32  ;;  %v602_v5 = vrot.slane %v342_v61, %v433_v35  ;;  %v609_v6 = vrot.slane %v342_v61, %v440_v37  ;;  %v616_v7 = vrot.slane %v342_v61, %v447_v39 }
  0x48   : > { %274 = vmax.xlane.f32.xlu0 %v273_v21  ;;  %v623_v8 = vrot.slane %v342_v61, %v454_v41  ;;  %v1715_v18 = vmov 1966171168   ;;  %vm1239_vm7 = vcmask 1043459   ;;  %vm1241_vm8 = vcmask 1044484  }
  0x49   : > { %v346_v19 = vunpack.c.l.s4 %v1715_v18  ;;  %vm1243_vm9 = vcmask 1045509   ;;  %vm1245_vm10 = vcmask 1046534   ;;  %vm1247_vm11 = vcmask 1047559  }
  0x4a   : > { %vm1306_vm12 = vcmask 15360  }
  0x58   : > { %408 = vbcast.lane.b32.xlu1 %v406_v28, 256 }
  0x5c   : > { %415 = vbcast.lane.b32.xlu1 %v413_v30, 256 }
  0x5e   : > { %392 = vbcast.lane.b32.xlu0 %v1523_v33, 256  ;;  %v347_v33 = vunpack.c.0.s8 %v346_v19 }
  0x60   : > { %422 = vbcast.lane.b32.xlu1 %v420_v34, 256 }
  0x62   : > { %429 = vbcast.lane.b32.xlu0 %v427_v36, 256 }
  0x64   : > { %436 = vbcast.lane.b32.xlu1 %v434_v38, 256 }
  0x66   : > { %443 = vbcast.lane.b32.xlu0 %v441_v40, 256  ;;  %v350_v40 = vsub.s32 %v347_v33, %v1866_v2 }
  0x68   : > { %450 = vbcast.lane.b32.xlu1 %v448_v42, 256 }
  0x6a   : > { %457 = vbcast.lane.b32.xlu0 %v455_v44, 256 }
  0x6c   : > { %464 = vbcast.lane.b32.xlu1 %v462_v45, 256 }
  0x6e   : > { %471 = vbcast.lane.b32.xlu0 %v469_v46, 256  ;;  %v337_v46 = vld [vmem:[%s2346_s1] sm:$0x3] }
  0x70   : > { %478 = vbcast.lane.b32.xlu1 %v476_v47, 256 }
  0x72   : > { %485 = vbcast.lane.b32.xlu0 %v483_v48, 256 }
  0x74   : > { %492 = vbcast.lane.b32.xlu1 %v490_v49, 256 }
  0x76   : > { %499 = vbcast.lane.b32.xlu0 %v497_v50, 256 }
  0x78   : > { %506 = vbcast.lane.b32.xlu1 %v504_v51, 256  ;;  %v1716_v51 = vmov 0  }
  0x79   : > { %1589 = vset.pattern.permute.xlu0 %v1716_v51  ;;  %1588 = vset.pattern.permute.xlu1 %v1716_v51 }
  0x7a   : > { %513 = vbcast.lane.b32.xlu0 %v511_v53, 256 }
  0x7c   : > { %520 = vbcast.lane.b32.xlu1 %v518_v54, 256 }
  0x7e   : > { %527 = vbcast.lane.b32.xlu0 %v525_v55, 256 }
  0x80   : > { %534 = vbcast.lane.b32.xlu1 %v532_v56, 256 }
  0x82   : > { %541 = vbcast.lane.b32.xlu0 %v539_v57, 256 }
  0x84   : > { %548 = vbcast.lane.b32.xlu1 %v546_v58, 256 }
  0x86   : > { %555 = vbcast.lane.b32.xlu0 %v553_v59, 256 }
  0x88   : > { %562 = vbcast.lane.b32.xlu1 %v560_v60, 256 }
  0x8a   : > { %569 = vbcast.lane.b32.xlu0 %v567_v62, 256 }
  0x8c   : > { %576 = vbcast.lane.b32.xlu1 %v574_v63, 256 }
  0x8e   : > { %583 = vbcast.lane.b32.xlu0 %v581_v0, 256 }
  0x90   : > { %590 = vbcast.lane.b32.xlu1 %v588_v1, 256 }
  0x92   : > { %597 = vbcast.lane.b32.xlu0 %v595_v4, 256 }
  0x94   : > { %604 = vbcast.lane.b32.xlu1 %v602_v5, 256 }
  0x96   : > { %611 = vbcast.lane.b32.xlu0 %v609_v6, 256 }
  0x98   : > { %618 = vbcast.lane.b32.xlu1 %v616_v7, 256 }
  0x9a   : > { %625 = vbcast.lane.b32.xlu0 %v623_v8, 256 }
  0xc8   : > { %v259_v9 = vpop.xlane.xlu1 %258 }
  0xc9   : > { %v253_v10 = vpop.xlane.xlu0 %252  ;;  %v265_v14 = vmul.f32 0.00390625, %v259_v9 }
  0xca   : > { %v263_v11 = vmul.f32 0.00390625, %v253_v10 }
  0xcb   : > { %v300_v27 = vrot.slane %v265_v14, %v1878_v12 }
  0xcc   : > { %v262_v13 = vpop.xlane.xlu1 %261  ;;  %v288_v20 = vrot.slane %v263_v11, %v1869_v3 }
  0xcd   : > { %v266_v15 = vmul.f32 0.00390625, %v262_v13  ;;  %v256_v16 = vpop.xlane.xlu0 %255 }
  0xce   : > { %v264_v17 = vmul.f32 0.00390625, %v256_v16 }
  0xcf   : > { %v307_v21 = vrot.slane %v266_v15, %v1883_v24 }
  0xd0   : > { %v293_v22 = vrot.slane %v264_v17, %v1886_v25  ;;  %v272_v23 = vpop.xlane.xlu1 %271 }
  0xd1   : > { %v269_v28 = vpop.xlane.xlu0 %268  ;;  %v322_v30 = vrot.slane %v272_v23, %v1886_v25 }
  0xd2   : > { %v295_v29 = vsel %vm294_vm0, %v293_v22, %v288_v20  ;;  %v318_v31 = vrot.slane %v269_v28, %v1869_v3 }
  0xd3   : > { %v302_v32 = vsel %vm301_vm1, %v300_v27, %v295_v29 }
  0xd4   : > { %v278_v34 = vpop.xlane.xlu1 %277  ;;  %v309_v35 = vsel %vm308_vm2, %v307_v21, %v302_v32  ;;  %v323_v39 = vsel %vm294_vm0, %v322_v30, %v318_v31 }
  0xd5   : > { %v275_v36 = vpop.xlane.xlu0 %274  ;;  %v332_v37 = vrot.slane %v278_v34, %v1883_v24 }
  0xd6   : > { %v327_v38 = vrot.slane %v275_v36, %v1878_v12 }
  0xd8   : > { %v328_v41 = vsel %vm301_vm1, %v327_v38, %v323_v39  ;;  %v1947_v53 = vpop.permute.xlu1 %408 }
  0xd9   : > { %v333_v25 = vsel %vm308_vm2, %v332_v37, %v328_v41  ;;  %v393_v52 = vpop.permute.xlu0 %392 }
  0xda   : > { %v336_v42 = vsel %vm335_vm3, %v309_v35, %v333_v25 }
  0xdb   : > { %v351_v43 = vrot.slane %v336_v42, %v350_v40 }
  0xdc   : > { %v1951_v55 = vpop.permute.xlu1 %415 }
  0xdd   : > { %v359_v44 = vrot.slane %v351_v43, %v350_v40  ;;  %v352_v45 = vcombine.high %v351_v43, %v351_v43  ;;  %v1949_v54 = vpop.permute.xlu0 %429 }
  0xdf   : > { %v370_v24 = vrot.slane %v359_v44, %v1889_v26  ;;  %v366_v47 = vrot.slane %v352_v45, %v350_v40 }
  0xe0   : > { %v1955_v57 = vpop.permute.xlu1 %422 }
  0xe1   : > { %v377_v12 = vmul.f32 %v370_v24, %v337_v46  ;;  %v374_v48 = vrot.slane %v366_v47, %v1889_v26  ;;  %v1953_v56 = vpop.permute.xlu0 %443 }
  0xe3   : > { %v380_v49 = vsel %vm379_vm4, %v377_v12, 0.0  ;;  %v378_v2 = vmul.f32 %v374_v48, %v337_v46 }
  0xe4   : > { %381 = vadd.xlane.f32.xlu0 %v380_v49  ;;  %v1959_v58 = vpop.permute.xlu1 %436 }
  0xe5   : > { %v383_v50 = vsel %vm379_vm4, %v378_v2, 0.0  ;;  %v1957_v26 = vpop.permute.xlu0 %457 }
  0xe6   : > { %384 = vadd.xlane.f32.xlu1 %v383_v50 }
  0xe8   : > { %v1963_v60 = vpop.permute.xlu1 %450 }
  0xe9   : > { %v1961_v59 = vpop.permute.xlu0 %471 }
  0xec   : > { %v1967_v62 = vpop.permute.xlu1 %464 }
  0xed   : > { %v1965_v61 = vpop.permute.xlu0 %485 }
  0xf0   : > { %v1971_v0 = vpop.permute.xlu1 %478 }
  0xf1   : > { %v1969_v63 = vpop.permute.xlu0 %499 }
  0xf4   : > { %v1975_v4 = vpop.permute.xlu1 %492 }
  0xf5   : > { %v1973_v1 = vpop.permute.xlu0 %513 }
  0xf8   : > { %v1979_v6 = vpop.permute.xlu1 %506 }
  0xf9   : > { %v1977_v5 = vpop.permute.xlu0 %527 }
  0xfc   : > { %v1983_v8 = vpop.permute.xlu1 %520 }
  0xfd   : > { %v1981_v7 = vpop.permute.xlu0 %541 }
 0x100   : > { %v1987_v10 = vpop.permute.xlu1 %534 }
 0x101   : > { %v1985_v9 = vpop.permute.xlu0 %555 }
 0x104   : > { %v1991_v13 = vpop.permute.xlu1 %548 }
 0x105   : > { %v1989_v11 = vpop.permute.xlu0 %569 }
 0x108   : > { %v1995_v15 = vpop.permute.xlu1 %562 }
 0x109   : > { %v1993_v14 = vpop.permute.xlu0 %583 }
 0x10c   : > { %v1999_v17 = vpop.permute.xlu1 %576 }
 0x10d   : > { %v1997_v16 = vpop.permute.xlu0 %597 }
 0x110   : > { %v2003_v19 = vpop.permute.xlu1 %590 }
 0x111   : > { %v2001_v18 = vpop.permute.xlu0 %611 }
 0x114   : > { %v2005_v21 = vpop.permute.xlu1 %604 }
 0x115   : > { %v626_v20 = vpop.permute.xlu0 %625 }
 0x118   : > { %v2009_v28 = vpop.permute.xlu1 %618 }
 0x171   : > { %v382_v22 = vpop.xlane.xlu0 %381 }
 0x172   : > { %v395_v23 = vadd.f32 %v393_v52, %v382_v22 }
 0x173   : > { %v385_v33 = vpop.xlane.xlu1 %384 }
 0x174   : > { %v2007_v27 = vmax.f32 %v395_v23, 0.0  ;;  %v396_v37 = vadd.f32 %v393_v52, %v385_v33 }
 0x176   : > { %v659_v29 = vmul.f32 %v1947_v53, %v2007_v27  ;;  %v660_v30 = vmul.f32 %v1951_v55, %v2007_v27  ;;  %v663_v31 = vmul.f32 %v1959_v58, %v2007_v27  ;;  %v661_v32 = vmul.f32 %v1955_v57, %v2007_v27 }
 0x177   : > { %v690_v34 = vmul.f32 %v626_v20, %v2007_v27  ;;  %v665_v35 = vmul.f32 %v1963_v60, %v2007_v27  ;;  %v662_v36 = vmul.f32 %v1949_v54, %v2007_v27  ;;  %v667_v38 = vmul.f32 %v1967_v62, %v2007_v27 }
 0x178   : > { %791 = vperm.xlu0 %1589, %v660_v30   ;;  %788 = vperm.xlu1 %1588, %v659_v29   ;;  %v664_v39 = vmul.f32 %v1953_v56, %v2007_v27  ;;  %v2028_v40 = vmax.f32 %v396_v37, 0.0  ;;  %v669_v41 = vmul.f32 %v1971_v0, %v2007_v27  ;;  %v666_v25 = vmul.f32 %v1957_v26, %v2007_v27 }
 0x179   : > { %v671_v43 = vmul.f32 %v1975_v4, %v2007_v27  ;;  %v668_v44 = vmul.f32 %v1961_v59, %v2007_v27  ;;  %v673_v45 = vmul.f32 %v1979_v6, %v2007_v27  ;;  %v670_v46 = vmul.f32 %v1965_v61, %v2007_v27 }
 0x17a   : > { %v2035_v42 = vmul.f32 %v626_v20, %v2028_v40  ;;  %v675_v24 = vmul.f32 %v1983_v8, %v2007_v27  ;;  %v672_v47 = vmul.f32 %v1969_v63, %v2007_v27  ;;  %v677_v12 = vmul.f32 %v1987_v10, %v2007_v27 }
 0x17b   : > { %v674_v48 = vmul.f32 %v1973_v1, %v2007_v27  ;;  %v684_v49 = vmul.f32 %v1993_v14, %v2007_v27  ;;  %v676_v2 = vmul.f32 %v1977_v5, %v2007_v27  ;;  %v678_v50 = vmul.f32 %v1981_v7, %v2007_v27 }
 0x17c   : > { %800 = vperm.xlu0 %1589, %v663_v31   ;;  %794 = vperm.xlu1 %1588, %v661_v32   ;;  %v683_v51 = vmul.f32 %v1999_v17, %v2007_v27  ;;  %v679_v52 = vmul.f32 %v1991_v13, %v2007_v27  ;;  %v685_v20 = vmul.f32 %v2003_v19, %v2007_v27 }
 0x17d   : > { %v680_v22 = vmul.f32 %v1985_v9, %v2007_v27  ;;  %v686_v23 = vmul.f32 %v1997_v16, %v2007_v27  ;;  %v681_v29 = vmul.f32 %v1995_v15, %v2007_v27  ;;  %v687_v30 = vmul.f32 %v2005_v21, %v2007_v27 }
 0x17e   : > { %v682_v31 = vmul.f32 %v1989_v11, %v2007_v27  ;;  %v688_v32 = vmul.f32 %v2001_v18, %v2007_v27  ;;  %v692_v33 = vmul.f32 %v1951_v55, %v2028_v40  ;;  %v708_v37 = vmul.f32 %v1977_v5, %v2028_v40 }
 0x17f   : > { %v716_v55 = vmul.f32 %v1993_v14, %v2028_v40  ;;  %v715_v5 = vmul.f32 %v1999_v17, %v2028_v40  ;;  %v701_v14 = vmul.f32 %v1971_v0, %v2028_v40  ;;  %v702_v17 = vmul.f32 %v1965_v61, %v2028_v40 }
 0x180   : > { %806 = vperm.xlu0 %1589, %v665_v35   ;;  %797 = vperm.xlu1 %1588, %v662_v36   ;;  %v689_v35 = vmul.f32 %v2009_v28, %v2007_v27  ;;  %v700_v36 = vmul.f32 %v1961_v59, %v2028_v40  ;;  %v699_v27 = vmul.f32 %v1967_v62, %v2028_v40 }
 0x181   : > { %v693_v59 = vmul.f32 %v1955_v57, %v2028_v40  ;;  %v694_v62 = vmul.f32 %v1949_v54, %v2028_v40  ;;  %v710_v57 = vmul.f32 %v1981_v7, %v2028_v40  ;;  %v711_v54 = vmul.f32 %v1991_v13, %v2028_v40 }
 0x182   : > { %v718_v0 = vmul.f32 %v1997_v16, %v2028_v40  ;;  %v696_v7 = vmul.f32 %v1953_v56, %v2028_v40  ;;  %v719_v61 = vmul.f32 %v2005_v21, %v2028_v40  ;;  %v697_v13 = vmul.f32 %v1963_v60, %v2028_v40 }
 0x183   : > { %v704_v16 = vmul.f32 %v1969_v63, %v2028_v40  ;;  %v713_v56 = vmul.f32 %v1995_v15, %v2028_v40  ;;  %v705_v21 = vmul.f32 %v1979_v6, %v2028_v40  ;;  %v714_v60 = vmul.f32 %v1989_v11, %v2028_v40 }
 0x184   : > { %812 = vperm.xlu0 %1589, %v667_v38   ;;  %803 = vperm.xlu1 %1588, %v664_v39   ;;  %v691_v38 = vmul.f32 %v1947_v53, %v2028_v40  ;;  %v709_v53 = vmul.f32 %v1987_v10, %v2028_v40  ;;  %v695_v10 = vmul.f32 %v1959_v58, %v2028_v40 }
 0x185   : > { %v712_v58 = vmul.f32 %v1985_v9, %v2028_v40  ;;  %v698_v9 = vmul.f32 %v1957_v26, %v2028_v40  ;;  %v721_v63 = vmul.f32 %v2009_v28, %v2028_v40  ;;  %v706_v15 = vmul.f32 %v1973_v1, %v2028_v40 }
 0x188   : > { %818 = vperm.xlu0 %1589, %v669_v41   ;;  %809 = vperm.xlu1 %1588, %v666_v25  }
 0x18c   : > { %824 = vperm.xlu0 %1589, %v671_v43   ;;  %815 = vperm.xlu1 %1588, %v668_v44  }
 0x190   : > { %830 = vperm.xlu0 %1589, %v673_v45   ;;  %821 = vperm.xlu1 %1588, %v670_v46  }
 0x194   : > { %836 = vperm.xlu0 %1589, %v675_v24   ;;  %827 = vperm.xlu1 %1588, %v672_v47  }
 0x198   : > { %842 = vperm.xlu0 %1589, %v677_v12   ;;  %833 = vperm.xlu1 %1588, %v674_v48  }
 0x19c   : > { %863 = vperm.xlu0 %1589, %v684_v49   ;;  %839 = vperm.xlu1 %1588, %v676_v2  }
 0x1a0   : > { %845 = vperm.xlu0 %1589, %v678_v50   ;;  %860 = vperm.xlu1 %1588, %v683_v51  }
 0x1a4   : > { %848 = vperm.xlu0 %1589, %v679_v52   ;;  %866 = vperm.xlu1 %1588, %v685_v20  }
 0x1a8   : > { %851 = vperm.xlu0 %1589, %v680_v22   ;;  %869 = vperm.xlu1 %1588, %v686_v23  }
 0x1ac   : > { %854 = vperm.xlu0 %1589, %v681_v29   ;;  %872 = vperm.xlu1 %1588, %v687_v30  }
 0x1b0   : > { %857 = vperm.xlu0 %1589, %v682_v31   ;;  %875 = vperm.xlu1 %1588, %v688_v32  }
 0x1b4   : > { %887 = vperm.xlu0 %1589, %v692_v33   ;;  %878 = vperm.xlu1 %1588, %v689_v35  }
 0x1b8   : > { %911 = vperm.xlu0 %1589, %v700_v36   ;;  %881 = vperm.xlu1 %1588, %v690_v34   ;;  %v707_v34 = vmul.f32 %v1983_v8, %v2028_v40  ;;  %v717_v8 = vmul.f32 %v2003_v19, %v2028_v40  ;;  %v703_v19 = vmul.f32 %v1975_v4, %v2028_v40 }
 0x1b9   : > { %v720_v4 = vmul.f32 %v2001_v18, %v2028_v40 }
 0x1bc   : > { %935 = vperm.xlu0 %1589, %v708_v37   ;;  %884 = vperm.xlu1 %1588, %v691_v38  }
 0x1c0   : > { %959 = vperm.xlu0 %1589, %v716_v55   ;;  %908 = vperm.xlu1 %1588, %v699_v27  }
 0x1c4   : > { %890 = vperm.xlu0 %1589, %v693_v59   ;;  %932 = vperm.xlu1 %1588, %v707_v34  }
 0x1c8   : > { %938 = vperm.xlu0 %1589, %v709_v53   ;;  %956 = vperm.xlu1 %1588, %v715_v5  }
 0x1cc   : > { %893 = vperm.xlu0 %1589, %v694_v62   ;;  %914 = vperm.xlu1 %1588, %v701_v14  }
 0x1d0   : > { %941 = vperm.xlu0 %1589, %v710_v57   ;;  %962 = vperm.xlu1 %1588, %v717_v8  }
 0x1d4   : > { %896 = vperm.xlu0 %1589, %v695_v10   ;;  %917 = vperm.xlu1 %1588, %v702_v17  }
 0x1d8   : > { %944 = vperm.xlu0 %1589, %v711_v54   ;;  %965 = vperm.xlu1 %1588, %v718_v0  }
 0x1dc   : > { %899 = vperm.xlu0 %1589, %v696_v7   ;;  %920 = vperm.xlu1 %1588, %v703_v19  }
 0x1e0   : > { %947 = vperm.xlu0 %1589, %v712_v58   ;;  %968 = vperm.xlu1 %1588, %v719_v61  }
 0x1e4   : > { %902 = vperm.xlu0 %1589, %v697_v13   ;;  %923 = vperm.xlu1 %1588, %v704_v16  }
 0x1e8   : > { %950 = vperm.xlu0 %1589, %v713_v56   ;;  %971 = vperm.xlu1 %1588, %v720_v4  }
 0x1ec   : > { %905 = vperm.xlu0 %1589, %v698_v9   ;;  %926 = vperm.xlu1 %1588, %v705_v21  }
 0x1f0   : > { %953 = vperm.xlu0 %1589, %v714_v60   ;;  %974 = vperm.xlu1 %1588, %v721_v63  }
 0x1f4   : > { %929 = vperm.xlu1 %1588, %v706_v15  }
 0x1f7   : > { %v792_v18 = vpop.permute.xlu0 %791  ;;  %v789_v39 = vpop.permute.xlu1 %788 }
 0x1f8   : > { %977 = vperm.xlu1 %1588, %v2035_v42   ;;  %v986_v41 = vrot.slane %v792_v18, %v1869_v3  ;;  %v982_v25 = vrot.slane %v789_v39, %v1869_v3 }
 0x1fa   : > { %v1236_v1 = vsel %vm1235_vm5, %v986_v41, %v982_v25 }
 0x1fb   : > { %v801_v26 = vpop.permute.xlu0 %800  ;;  %v795_v6 = vpop.permute.xlu1 %794 }
 0x1fc   : > { %v990_v11 = vrot.slane %v795_v6, %v1869_v3  ;;  %v998_v46 = vrot.slane %v801_v26, %v1869_v3 }
 0x1fe   : > { %v1238_v44 = vsel %vm1237_vm6, %v990_v11, %v1236_v1 }
 0x1ff   : > { %v807_v28 = vpop.permute.xlu0 %806  ;;  %v798_v43 = vpop.permute.xlu1 %797 }
 0x200   : > { %v994_v40 = vrot.slane %v798_v43, %v1869_v3  ;;  %v1006_v2 = vrot.slane %v807_v28, %v1869_v3 }
 0x202   : > { %v1240_v42 = vsel %vm1239_vm7, %v994_v40, %v1238_v44 }
 0x203   : > { %v813_v45 = vpop.permute.xlu0 %812  ;;  %v804_v24 = vpop.permute.xlu1 %803  ;;  %v1242_v12 = vsel %vm1241_vm8, %v998_v46, %v1240_v42 }
 0x204   : > { %v1002_v47 = vrot.slane %v804_v24, %v1869_v3  ;;  %v1014_v29 = vrot.slane %v813_v45, %v1869_v3 }
 0x206   : > { %v1244_v48 = vsel %vm1243_vm9, %v1002_v47, %v1242_v12 }
 0x207   : > { %v819_v49 = vpop.permute.xlu0 %818  ;;  %v810_v50 = vpop.permute.xlu1 %809  ;;  %v1246_v52 = vsel %vm1245_vm10, %v1006_v2, %v1244_v48 }
 0x208   : > { %v1010_v51 = vrot.slane %v810_v50, %v1869_v3  ;;  %v1022_v35 = vrot.slane %v819_v49, %v1869_v3 }
 0x20a   : > { %v1248_v22 = vsel %vm1247_vm11, %v1010_v51, %v1246_v52 }
 0x20b   : > { %v825_v20 = vpop.permute.xlu0 %824  ;;  %v816_v23 = vpop.permute.xlu1 %815  ;;  %v1307_v31 = vsel %vm1306_vm12, %v1248_v22, 0.0 }
 0x20c   : > { %v1018_v30 = vrot.slane %v816_v23, %v1869_v3  ;;  %v1030_v59 = vrot.slane %v825_v20, %v1869_v3 }
 0x20e   : > { %v1249_v32 = vsel %vm1235_vm5, %v1018_v30, %v1014_v29 }
 0x20f   : > { %v831_v33 = vpop.permute.xlu0 %830  ;;  %1308 = vadd.xlane.f32.xlu0 %v1307_v31  ;;  %v822_v36 = vpop.permute.xlu1 %821  ;;  %v1250_v38 = vsel %vm1237_vm6, %v1022_v35, %v1249_v32 }
 0x210   : > { %v1026_v37 = vrot.slane %v822_v36, %v1869_v3  ;;  %v1038_v57 = vrot.slane %v831_v33, %v1869_v3 }
 0x212   : > { %v1251_v55 = vsel %vm1239_vm7, %v1026_v37, %v1250_v38 }
 0x213   : > { %v837_v27 = vpop.permute.xlu0 %836  ;;  %v828_v34 = vpop.permute.xlu1 %827  ;;  %v1252_v5 = vsel %vm1241_vm8, %v1030_v59, %v1251_v55 }
 0x214   : > { %v1034_v53 = vrot.slane %v828_v34, %v1869_v3  ;;  %v1046_v9 = vrot.slane %v837_v27, %v1869_v3 }
 0x216   : > { %v1253_v62 = vsel %vm1243_vm9, %v1034_v53, %v1252_v5 }
 0x217   : > { %v843_v14 = vpop.permute.xlu0 %842  ;;  %v834_v8 = vpop.permute.xlu1 %833  ;;  %v1254_v17 = vsel %vm1245_vm10, %v1038_v57, %v1253_v62 }
 0x218   : > { %v1042_v10 = vrot.slane %v834_v8, %v1869_v3  ;;  %v1054_v15 = vrot.slane %v843_v14, %v1869_v3 }
 0x21a   : > { %v1255_v0 = vsel %vm1247_vm11, %v1042_v10, %v1254_v17 }
 0x21b   : > { %v864_v54 = vpop.permute.xlu0 %863  ;;  %v840_v7 = vpop.permute.xlu1 %839  ;;  %v1310_v19 = vsel %vm1306_vm12, %v1255_v0, 0.0 }
 0x21c   : > { %1311 = vadd.xlane.f32.xlu1 %v1310_v19  ;;  %v1050_v56 = vrot.slane %v840_v7, %v1869_v3  ;;  %v1082_v47 = vrot.slane %v864_v54, %v1869_v3 }
 0x21e   : > { %v1256_v60 = vsel %vm1235_vm5, %v1050_v56, %v1046_v9 }
 0x21f   : > { %v846_v58 = vpop.permute.xlu0 %845  ;;  %v861_v61 = vpop.permute.xlu1 %860  ;;  %v1257_v41 = vsel %vm1237_vm6, %v1054_v15, %v1256_v60 }
 0x220   : > { %v1058_v63 = vrot.slane %v846_v58, %v1869_v3  ;;  %v1078_v42 = vrot.slane %v861_v61, %v1869_v3 }
 0x222   : > { %v1258_v11 = vsel %vm1239_vm7, %v1058_v63, %v1257_v41  ;;  %v1263_v51 = vsel %vm1235_vm5, %v1082_v47, %v1078_v42 }
 0x223   : > { %v849_v13 = vpop.permute.xlu0 %848  ;;  %v867_v16 = vpop.permute.xlu1 %866 }
 0x224   : > { %v1062_v18 = vrot.slane %v849_v13, %v1869_v3  ;;  %v1086_v46 = vrot.slane %v867_v16, %v1869_v3 }
 0x226   : > { %v1259_v28 = vsel %vm1241_vm8, %v1062_v18, %v1258_v11  ;;  %v1264_v20 = vsel %vm1237_vm6, %v1086_v46, %v1263_v51 }
 0x227   : > { %v852_v4 = vpop.permute.xlu0 %851  ;;  %v870_v21 = vpop.permute.xlu1 %869 }
 0x228   : > { %v1066_v26 = vrot.slane %v852_v4, %v1869_v3  ;;  %v1090_v12 = vrot.slane %v870_v21, %v1869_v3 }
 0x22a   : > { %v1260_v1 = vsel %vm1243_vm9, %v1066_v26, %v1259_v28  ;;  %v1265_v23 = vsel %vm1239_vm7, %v1090_v12, %v1264_v20 }
 0x22b   : > { %v855_v39 = vpop.permute.xlu0 %854  ;;  %v873_v6 = vpop.permute.xlu1 %872 }
 0x22c   : > { %v1070_v25 = vrot.slane %v855_v39, %v1869_v3  ;;  %v1094_v2 = vrot.slane %v873_v6, %v1869_v3 }
 0x22e   : > { %v1261_v45 = vsel %vm1245_vm10, %v1070_v25, %v1260_v1  ;;  %v1266_v30 = vsel %vm1241_vm8, %v1094_v2, %v1265_v23 }
 0x22f   : > { %v858_v43 = vpop.permute.xlu0 %857  ;;  %v876_v44 = vpop.permute.xlu1 %875 }
 0x230   : > { %v1074_v40 = vrot.slane %v858_v43, %v1869_v3  ;;  %v1098_v52 = vrot.slane %v876_v44, %v1869_v3 }
 0x232   : > { %v1262_v24 = vsel %vm1247_vm11, %v1074_v40, %v1261_v45  ;;  %v1267_v32 = vsel %vm1243_vm9, %v1098_v52, %v1266_v30 }
 0x233   : > { %v888_v48 = vpop.permute.xlu0 %887  ;;  %v1313_v49 = vsel %vm1306_vm12, %v1262_v24, 0.0  ;;  %v879_v50 = vpop.permute.xlu1 %878 }
 0x234   : > { %1314 = vadd.xlane.f32.xlu0 %v1313_v49  ;;  %v1102_v22 = vrot.slane %v879_v50, %v1869_v3  ;;  %v1114_v25 = vrot.slane %v888_v48, %v1869_v3 }
 0x236   : > { %v1268_v35 = vsel %vm1245_vm10, %v1102_v22, %v1267_v32 }
 0x237   : > { %v2200_v29 = vpop.permute.xlu0 %911  ;;  %v882_v31 = vpop.permute.xlu1 %881 }
 0x238   : > { %v1106_v33 = vrot.slane %v882_v31, %v1869_v3 }
 0x23a   : > { %v1269_v37 = vsel %vm1247_vm11, %v1106_v33, %v1268_v35 }
 0x23b   : > { %v936_v36 = vpop.permute.xlu0 %935  ;;  %v885_v38 = vpop.permute.xlu1 %884  ;;  %v1316_v55 = vsel %vm1306_vm12, %v1269_v37, 0.0 }
 0x23c   : > { %1317 = vadd.xlane.f32.xlu0 %v1316_v55  ;;  %v1110_v26 = vrot.slane %v885_v38, %v1869_v3  ;;  %v1178_v12 = vrot.slane %v936_v36, %v1869_v3 }
 0x23e   : > { %v1270_v1 = vsel %vm1235_vm5, %v1114_v25, %v1110_v26 }
 0x23f   : > { %v960_v27 = vpop.permute.xlu0 %959  ;;  %v2208_v59 = vpop.permute.xlu1 %908 }
 0x240   : > { %v1210_v14 = vrot.slane %v960_v27, %v1869_v3  ;;  %v1142_v32 = vrot.slane %v2208_v59, %v1869_v3  ;;  %v1146_v27 = vrot.slane %v2200_v29, %v1869_v3 }
 0x243   : > { %v891_v34 = vpop.permute.xlu0 %890  ;;  %v933_v53 = vpop.permute.xlu1 %932 }
 0x244   : > { %v1118_v41 = vrot.slane %v891_v34, %v1869_v3  ;;  %v1174_v40 = vrot.slane %v933_v53, %v1869_v3 }
 0x246   : > { %v1271_v45 = vsel %vm1237_vm6, %v1118_v41, %v1270_v1  ;;  %v1284_v20 = vsel %vm1235_vm5, %v1178_v12, %v1174_v40 }
 0x247   : > { %v939_v5 = vpop.permute.xlu0 %938  ;;  %v957_v62 = vpop.permute.xlu1 %956 }
 0x248   : > { %v1206_v57 = vrot.slane %v957_v62, %v1869_v3  ;;  %v1182_v46 = vrot.slane %v939_v5, %v1869_v3 }
 0x24a   : > { %v1291_v8 = vsel %vm1235_vm5, %v1210_v14, %v1206_v57  ;;  %v1285_v33 = vsel %vm1237_vm6, %v1182_v46, %v1284_v20 }
 0x24b   : > { %v894_v10 = vpop.permute.xlu0 %893  ;;  %v2213_v17 = vpop.permute.xlu1 %914 }
 0x24c   : > { %v1122_v11 = vrot.slane %v894_v10, %v1869_v3  ;;  %v1150_v37 = vrot.slane %v2213_v17, %v1869_v3  ;;  %v1277_v10 = vsel %vm1235_vm5, %v1146_v27, %v1142_v32 }
 0x24e   : > { %v1272_v48 = vsel %vm1239_vm7, %v1122_v11, %v1271_v45 }
 0x24f   : > { %v942_v54 = vpop.permute.xlu0 %941  ;;  %v963_v0 = vpop.permute.xlu1 %962 }
 0x250   : > { %v1214_v7 = vrot.slane %v963_v0, %v1869_v3  ;;  %v1186_v49 = vrot.slane %v942_v54, %v1869_v3  ;;  %v1278_v54 = vsel %vm1237_vm6, %v1150_v37, %v1277_v10 }
 0x252   : > { %v1292_v19 = vsel %vm1237_vm6, %v1214_v7, %v1291_v8  ;;  %v1286_v38 = vsel %vm1239_vm7, %v1186_v49, %v1285_v33 }
 0x253   : > { %v897_v58 = vpop.permute.xlu0 %896  ;;  %v2217_v61 = vpop.permute.xlu1 %917 }
 0x254   : > { %v1126_v28 = vrot.slane %v897_v58, %v1869_v3  ;;  %v1154_v34 = vrot.slane %v2217_v61, %v1869_v3 }
 0x256   : > { %v1273_v2 = vsel %vm1241_vm8, %v1126_v28, %v1272_v48 }
 0x257   : > { %v945_v13 = vpop.permute.xlu0 %944  ;;  %v966_v16 = vpop.permute.xlu1 %965 }
 0x258   : > { %v1218_v56 = vrot.slane %v966_v16, %v1869_v3  ;;  %v1190_v50 = vrot.slane %v945_v13, %v1869_v3 }
 0x25a   : > { %v1293_v4 = vsel %vm1239_vm7, %v1218_v56, %v1292_v19  ;;  %v1287_v59 = vsel %vm1241_vm8, %v1190_v50, %v1286_v38  ;;  %v1279_v19 = vsel %vm1239_vm7, %v1154_v34, %v1278_v54 }
 0x25b   : > { %v900_v9 = vpop.permute.xlu0 %899  ;;  %v921_v21 = vpop.permute.xlu1 %920 }
 0x25c   : > { %v1130_v44 = vrot.slane %v900_v9, %v1869_v3  ;;  %v1158_v62 = vrot.slane %v921_v21, %v1869_v3 }
 0x25e   : > { %v1274_v22 = vsel %vm1243_vm9, %v1130_v44, %v1273_v2  ;;  %v1280_v61 = vsel %vm1241_vm8, %v1158_v62, %v1279_v19  ;;  %v1609_v19 = vld [vmem:[%s1860_s28 + $0x18] sm:$0xff] }
 0x25f   : > { %v948_v60 = vpop.permute.xlu0 %947  ;;  %v969_v63 = vpop.permute.xlu1 %968 }
 0x260   : > { %v1222_v15 = vrot.slane %v969_v63, %v1869_v3  ;;  %v1194_v23 = vrot.slane %v948_v60, %v1869_v3  ;;  %v1524_v60 = vld [vmem:[%s2349_s4] ss:$0 sm:$0xff] }
 0x262   : > { %v1294_v18 = vsel %vm1241_vm8, %v1222_v15, %v1293_v4  ;;  %v1288_v14 = vsel %vm1243_vm9, %v1194_v23, %v1287_v59 }
 0x263   : > { %v903_v39 = vpop.permute.xlu0 %902  ;;  %v924_v6 = vpop.permute.xlu1 %923 }
 0x264   : > { %v1134_v24 = vrot.slane %v903_v39, %v1869_v3  ;;  %v1162_v29 = vrot.slane %v924_v6, %v1869_v3 }
 0x266   : > { %v1275_v36 = vsel %vm1245_vm10, %v1134_v24, %v1274_v22  ;;  %v1281_v16 = vsel %vm1243_vm9, %v1162_v29, %v1280_v61  ;;  %v1607_v29 = vld [vmem:[%s1860_s28 + $0x8] sm:$0xff] }
 0x267   : > { %v951_v43 = vpop.permute.xlu0 %950  ;;  %v972_v42 = vpop.permute.xlu1 %971 }
 0x268   : > { %v1226_v47 = vrot.slane %v972_v42, %v1869_v3  ;;  %v1198_v35 = vrot.slane %v951_v43, %v1869_v3 }
 0x26a   : > { %v1295_v51 = vsel %vm1243_vm9, %v1226_v47, %v1294_v18  ;;  %v1289_v17 = vsel %vm1245_vm10, %v1198_v35, %v1288_v14 }
 0x26b   : > { %v906_v52 = vpop.permute.xlu0 %905  ;;  %v927_v31 = vpop.permute.xlu1 %926 }
 0x26c   : > { %v1138_v30 = vrot.slane %v906_v52, %v1869_v3  ;;  %v1166_v0 = vrot.slane %v927_v31, %v1869_v3 }
 0x26e   : > { %v1276_v55 = vsel %vm1247_vm11, %v1138_v30, %v1275_v36  ;;  %v1282_v4 = vsel %vm1245_vm10, %v1166_v0, %v1281_v16  ;;  %v1608_v0 = vld [vmem:[%s1860_s28 + $0x10] sm:$0xff] }
 0x26f   : > { %v954_v53 = vpop.permute.xlu0 %953  ;;  %v1319_v5 = vsel %vm1306_vm12, %v1276_v55, 0.0  ;;  %v975_v8 = vpop.permute.xlu1 %974 }
 0x270   : > { %v1202_v57 = vrot.slane %v954_v53, %v1869_v3  ;;  %1320 = vadd.xlane.f32.xlu0 %v1319_v5  ;;  %v1230_v15 = vrot.slane %v975_v8, %v1869_v3  ;;  %v1606_v8 = vld [vmem:[%s1860_s28] sm:$0xff] }
 0x272   : > { %v1290_v7 = vsel %vm1247_vm11, %v1202_v57, %v1289_v17  ;;  %v1296_v39 = vsel %vm1245_vm10, %v1230_v15, %v1295_v51 }
 0x273   : > { %v1325_v58 = vsel %vm1306_vm12, %v1290_v7, 0.0  ;;  %v930_v13 = vpop.permute.xlu1 %929 }
 0x274   : > { %1326 = vadd.xlane.f32.xlu0 %v1325_v58  ;;  %v1170_v56 = vrot.slane %v930_v13, %v1869_v3  ;;  %v1610_v13 = vld [vmem:[%s1860_s28 + $0x20] sm:$0xff] }
 0x276   : > { %v1283_v9 = vsel %vm1247_vm11, %v1170_v56, %v1282_v4  ;;  %v1611_v56 = vld [vmem:[%s1860_s28 + $0x28] sm:$0xff] }
 0x277   : > { %v1322_v21 = vsel %vm1306_vm12, %v1283_v9, 0.0  ;;  %v978_v63 = vpop.permute.xlu1 %977 }
 0x278   : > { %1323 = vadd.xlane.f32.xlu1 %v1322_v21  ;;  %v1234_v18 = vrot.slane %v978_v63, %v1869_v3  ;;  %v1612_v21 = vld [vmem:[%s1860_s28 + $0x30] sm:$0xff]  ;;  %v1613_v63 = vld [vmem:[%s1860_s28 + $0x38] sm:$0xff] }
 0x27a   : > { %v1297_v26 = vsel %vm1247_vm11, %v1234_v18, %v1296_v39 }
 0x27b   : > { %v1328_v6 = vsel %vm1306_vm12, %v1297_v26, 0.0 }
 0x289   : > { %1341 = vbcast.lane.b32.xlu1 %v1524_v60, 264 }
 0x28a   : > { %1337 = vbcast.lane.b32.xlu0 %v1524_v60, 256 }
 0x28d   : > { %1345 = vbcast.lane.b32.xlu1 %v1524_v60, 272 }
 0x29c   : > { %v1309_v41 = vpop.xlane.xlu0 %1308 }
 0x2a9   : > { %v1312_v1 = vpop.xlane.xlu1 %1311 }
 0x2b1   : > { %1329 = vadd.xlane.f32.xlu1 %v1328_v6 }
 0x2c1   : > { %v1315_v25 = vpop.xlane.xlu0 %1314 }
 0x2c2   : > { %1349 = vbcast.lane.b32.xlu1 %v1524_v60, 280 }
 0x2c9   : > { %v1318_v11 = vpop.xlane.xlu0 %1317 }
 0x2fd   : > { %v1321_v28 = vpop.xlane.xlu0 %1320 }
 0x301   : > { %v1327_v43 = vpop.xlane.xlu0 %1326 }
 0x305   : > { %v1338_v40 = vpop.permute.xlu0 %1337  ;;  %v1324_v45 = vpop.xlane.xlu1 %1323 }
 0x306   : > { %v1355_v44 = vadd.f32 %v1338_v40, %v1309_v41  ;;  %v1359_v42 = vadd.f32 %v1338_v40, %v1321_v28 }
 0x308   : > { %v1363_v46 = vadd.f32 %v1359_v42, %v1355_v44 }
 0x309   : > { %v1342_v24 = vpop.permute.xlu1 %1341 }
 0x30a   : > { %v1525_v3 = vmul.f32 -1.442695, %v1363_v46  ;;  %v1356_v47 = vadd.f32 %v1342_v24, %v1312_v1  ;;  %v1360_v12 = vadd.f32 %v1342_v24, %v1324_v45 }
 0x30c   : > { %1590 = vpow2.f32 %v1525_v3  ;;  %v1364_v48 = vadd.f32 %v1360_v12, %v1356_v47 }
 0x30d   : > { %v1346_v49 = vpop.permute.xlu1 %1345 }
 0x30e   : > { %v1526_v2 = vmul.f32 -1.442695, %v1364_v48  ;;  %v1357_v50 = vadd.f32 %v1346_v49, %v1315_v25  ;;  %v1361_v51 = vadd.f32 %v1346_v49, %v1327_v43 }
 0x310   : > { %1592 = vpow2.f32 %v1526_v2  ;;  %v1365_v52 = vadd.f32 %v1361_v51, %v1357_v50 }
 0x312   : > { %v1527_v20 = vmul.f32 -1.442695, %v1365_v52 }
 0x314   : > { %1594 = vpow2.f32 %v1527_v20 }
 0x316   : > { %v1591_v22 = vpop.eup %1590 }
 0x317   : > { %v1379_v23 = vadd.f32 1.0, %v1591_v22 }
 0x319   : > { %1596 = vrcp.f32 %v1379_v23 }
 0x31a   : > { %v1593_v30 = vpop.eup %1592 }
 0x31b   : > { %v1380_v31 = vadd.f32 1.0, %v1593_v30 }
 0x31d   : > { %1598 = vrcp.f32 %v1380_v31 }
 0x31e   : > { %v1595_v32 = vpop.eup %1594 }
 0x31f   : > { %v1381_v33 = vadd.f32 1.0, %v1595_v32 }
 0x321   : > { %1600 = vrcp.f32 %v1381_v33 }
 0x323   : > { %v1597_v35 = vpop.eup %1596 }
 0x324   : > { %1393 = vperm.xlu0 %1589, %v1597_v35  }
 0x327   : > { %v1599_v36 = vpop.eup %1598 }
 0x328   : > { %1398 = vperm.xlu1 %1588, %v1599_v36  }
 0x32b   : > { %v1601_v37 = vpop.eup %1600 }
 0x32c   : > { %1403 = vperm.xlu0 %1589, %v1601_v37  }
 0x33e   : > { %v1330_v38 = vpop.xlane.xlu1 %1329 }
 0x342   : > { %v1350_v55 = vpop.permute.xlu1 %1349 }
 0x343   : > { %v1358_v27 = vadd.f32 %v1350_v55, %v1318_v11  ;;  %v1362_v34 = vadd.f32 %v1350_v55, %v1330_v38 }
 0x345   : > { %v1366_v59 = vadd.f32 %v1362_v34, %v1358_v27 }
 0x347   : > { %v1528_v53 = vmul.f32 -1.442695, %v1366_v59 }
 0x349   : > { %1602 = vpow2.f32 %v1528_v53 }
 0x353   : > { %v1603_v5 = vpop.eup %1602 }
 0x354   : > { %v1382_v62 = vadd.f32 1.0, %v1603_v5 }
 0x356   : > { %1604 = vrcp.f32 %v1382_v62 }
 0x360   : > { %v1605_v14 = vpop.eup %1604 }
 0x361   : > { %1408 = vperm.xlu1 %1588, %v1605_v14  }
 0x3a3   : > { %v1394_v57 = vpop.permute.xlu0 %1393 }
 0x3a4   : > { %v1411_v10 = vmul.f32 %v1606_v8, %v1394_v57  ;;  %v1412_v17 = vmul.f32 %v1607_v29, %v1394_v57 }
 0x3a6   : > { %1419 = vst [vmem:[%s242_s12] sm:$0xff] %v1411_v10  ;;  %1420 = vst [vmem:[%s242_s12 + $0x8] sm:$0xff] %v1412_v17 }
 0x3a7   : > { %v1399_v54 = vpop.permute.xlu1 %1398 }
 0x3a8   : > { %v1413_v7 = vmul.f32 %v1608_v0, %v1399_v54  ;;  %v1414_v58 = vmul.f32 %v1609_v19, %v1399_v54 }
 0x3aa   : > { %1421 = vst [vmem:[%s242_s12 + $0x10] sm:$0xff] %v1413_v7  ;;  %1422 = vst [vmem:[%s242_s12 + $0x18] sm:$0xff] %v1414_v58 }
 0x3ab   : > { %v1404_v61 = vpop.permute.xlu0 %1403 }
 0x3ac   : > { %v1415_v16 = vmul.f32 %v1610_v13, %v1404_v61  ;;  %v1416_v4 = vmul.f32 %v1611_v56, %v1404_v61 }
 0x3ae   : > { %1423 = vst [vmem:[%s242_s12 + $0x20] sm:$0xff] %v1415_v16  ;;  %1424 = vst [vmem:[%s242_s12 + $0x28] sm:$0xff] %v1416_v4 }
 0x3e0   : > { %v1409_v9 = vpop.permute.xlu1 %1408 }
 0x3e1   : > { %v1417_v60 = vmul.f32 %v1612_v21, %v1409_v9  ;;  %v1418_v15 = vmul.f32 %v1613_v63, %v1409_v9 }
 0x3e3   : > { %1425 = vst [vmem:[%s242_s12 + $0x30] sm:$0xff] %v1417_v60  ;;  %1426 = vst [vmem:[%s242_s12 + $0x38] sm:$0xff] %v1418_v15 }
 0x3e4   : > { %1657 = shalt.err (!%p1654_p2)
}
 0x3e5   : > { %s1658_s28 = scalar_lea.hbm %s2299_s8, 1024  ;;  %s1662_s26 = scalar_lea.hbm %s2350_s5, 2048 }
 0x3e6   : > { %p1659_p4 = scmp.ne.s32.totalorder %s2299_s8, %s1658_s28  ;;  %p1663_p9 = scmp.lt.u32.totalorder %s2299_s8, %s2350_s5 }
 0x3e7   : > { %p1664_p1 = scmp.lt.u32.totalorder %s1662_s26, %s1658_s28  ;;  %p1666_p6 = scmp.lt.u32.totalorder %s1658_s28, %s2299_s8 }
 0x3e8   : > { %p1660_p5 = pnand %p1659_p4, %p2357_p11 }
 0x3e9   : > { %p1665_p3 = por %p1664_p1, %p1663_p9 }
 0x3ea   : > { %p1661_p7 = pneg %p1660_p5 }
 0x3eb   : > { %p1667_p12 = por %p1666_p6, %p1665_p3 }
 0x3ed   : > { %p1668_p13 = pnand %p1667_p12, %p1661_p7 }
 0x3ef   : > { %1671 = shalt.err (!%p1668_p13)
}
 0x3f0   : > { %s1718_s14 = smov 256   ;;  %s1719_s15 = smov 16  }
 0x3f1   : > { %1538 = dma.vmem_to_hbm [thread:$0]  (%p2357_p11), %s2294_s25, 1024, %s2299_s8, %s1428_s7, %s1718_s14, %s1718_s14, %s1719_s15  }
 0x3f2 PF: > { %s1456_s16 = sand.u32 1, %s1698_s18   ;;  %p2358_p8 = scmp.ne.s32.totalorder %s2355_s6, 0 }
 0x3f3   : > { %p2359_p10 = scmp.ge.s32.totalorder %s1710_s21, 2  ;;  %s1457_s9 = scalar_lea.sflag [#allocation4], %s1456_s16 }
 0x3f5   : > { %p1545_p0 = pnand %p2359_p10, %p2358_p8 }
 0x3f7   : > { %1693 = dma.done.wait (!%p1545_p0), %s1457_s9, 1024  }
 0x3f8   : > { %1695 = vsyncadd (!%p1545_p0), %s1457_s9, 4294966272  ;;  %p18_p2 = scmp.ge.s32.totalorder %s1775_s24, 4   ;;  %s2360_s18 = smov %s1702_s19 }
 0x3f9   : > { %s2361_s19 = smov %s1706_s20  ;;  %s2362_s20 = smov %s1787_s27 }
 0x3fa   : > { %s2363_s21 = smov %s1775_s24  ;;  %20 = sbr.rel (!%p18_p2) target bundleno = 5 (0x5), region = 85 }
 0x401   :  { %1462 = vsyncpa [#allocation3], 1 }
 0x402   :  { %1464 = vsyncpa [#allocation3 + $0x1], 1 }
 0x403   :  { %1465 = vsyncpa [#allocation4], 1 }
 0x404   :  { %1467 = vsyncpa [#allocation4 + $0x1], 1 }

</bundles_post_ra>
